<compile_context>
chip_gen: v7x
topology: tpu7x:2x2x1
jax: 0.10.0
libtpu: 0.0.40
codegen_flags: <defaults>
</compile_context>

<pallas_src>
import jax
import jax.numpy as jnp
from jax.experimental import pallas as pl
from jax.experimental.pallas import tpu as pltpu

_MIB = 1024 * 1024


def _vmem_budget_bytes() -> int:
    """~75% of physical VMEM; conservative v7x-safe fallback if the query is unavailable."""
    try:
        cap = int(pltpu.get_tpu_info().vmem_capacity_bytes)
        if cap <= 0:
            raise ValueError
    except Exception:  # fall back to v7x's 64 MiB (smallest of the supported generations)
        cap = 64 * _MIB
    return max(32 * _MIB, (cap * 3) // 4)


def _target_block_bytes(budget: int) -> int:
    # ~8 MiB input blocks on v7x, ~16 MiB on v5e/v6e.  Leaves room for double-buffered
    # in+out blocks plus Mosaic internal scratch inside the budget.
    return max(2 * _MIB, min(16 * _MIB, budget // 6))


def _make_kernel(inv_c: float):
    def _gap_kernel(x_ref, o_ref):
        # Channel reduction (axis=1) with f32 accumulation, fused scale by 1/C.
        s = jnp.sum(x_ref[...], axis=1, dtype=jnp.float32, keepdims=True)
        o_ref[...] = (s * inv_c).astype(o_ref.dtype)

    return _gap_kernel


def _row_tile(rows: int, row_bytes: int, n_batch: int, target_bytes: int) -> int:
    """Sublane tile (multiple of 8, or the full extent) for `rows` rows of `row_bytes` bytes,
    aiming at `target_bytes` per input block while keeping >= ~8 total grid steps so the two
    v7x TensorCores both get sharded work."""
    if rows <= 8:
        return rows
    tr = (max(1, target_bytes // max(1, row_bytes)) // 8) * 8
    tr = max(8, min(tr, (rows // 8) * 8))
    desired_steps = 8
    if n_batch * pl.cdiv(rows, tr) < desired_steps:
        blocks_needed = pl.cdiv(desired_steps, max(1, n_batch))
        tr_small = max(8, (pl.cdiv(rows, blocks_needed) // 8) * 8)
        tr = min(tr, tr_small)
    return tr


def _vmem_limit(budget: int, block_in: int, block_out: int) -> int:
    # Double-buffered in/out blocks + headroom, capped at the generation-aware budget.
    return int(min(budget, max(32 * _MIB, 4 * (block_in + block_out) + 8 * _MIB)))


def global_average_pooling(x: jax.Array) -> jax.Array:
    """Equivalent of torch.mean(x, dim=1, keepdim=True) for NCHW input."""
    N, C, H, W = x.shape
    inv_c = 1.0 / float(C)
    itemsize = jnp.dtype(x.dtype).itemsize
    kernel = _make_kernel(inv_c)
    budget = _vmem_budget_bytes()
    target = _target_block_bytes(budget)

    def _call_rows(xr, rows, lanes):
        # xr: (N, C, rows, lanes) with a lane-dense last axis.
        tr = _row_tile(rows, C * lanes * itemsize, N, target)
        grid = (N, pl.cdiv(rows, tr))
        block_in = C * tr * lanes * itemsize
        block_out = tr * lanes * itemsize
        return pl.pallas_call(
            kernel,
            out_shape=jax.ShapeDtypeStruct((N, 1, rows, lanes), x.dtype),
            grid_spec=pl.GridSpec(
                grid=grid,
                in_specs=[pl.BlockSpec((1, C, tr, lanes), lambda n, r: (n, 0, r, 0))],
                out_specs=pl.BlockSpec((1, 1, tr, lanes), lambda n, r: (n, 0, r, 0)),
            ),
            compiler_params=pltpu.CompilerParams(
                dimension_semantics=("parallel", "parallel"),
                vmem_limit_bytes=_vmem_limit(budget, block_in, block_out),
            ),
        )(xr)

    if W % 128 == 0:
        # Lane axis already dense: keep NCHW and tile H (sublane axis).
        return _call_rows(x, H, W)

    hw = H * W
    if hw % 128 == 0:
        # Re-fold the flattened spatial axis into (rows, 128): channel sum stays a pure VPU
        # add over dense (8,128) tiles and output stores are full unmasked vst.
        out = _call_rows(x.reshape(N, C, hw // 128, 128), hw // 128, 128)
        return out.reshape(N, 1, H, W)

    if hw <= 128:
        # Small feature maps (e.g. 7x7): batch several images per block to amortize the
        # per-grid-step overhead; lane axis is the (short) flattened spatial extent.
        xf = x.reshape(N, C, hw)
        per_image = C * hw * itemsize
        tn = max(1, min(N, target // max(1, per_image)))
        # Keep >= min(N, 8) grid steps so both v7x TensorCores get work.
        tn = min(tn, max(1, pl.cdiv(N, min(N, 8))))
        grid = (pl.cdiv(N, tn),)
        block_in = tn * per_image
        block_out = tn * hw * itemsize
        out = pl.pallas_call(
            kernel,
            out_shape=jax.ShapeDtypeStruct((N, 1, hw), x.dtype),
            grid_spec=pl.GridSpec(
                grid=grid,
                in_specs=[pl.BlockSpec((tn, C, hw), lambda n: (n, 0, 0))],
                out_specs=pl.BlockSpec((tn, 1, hw), lambda n: (n, 0, 0)),
            ),
            compiler_params=pltpu.CompilerParams(
                dimension_semantics=("parallel",),
                vmem_limit_bytes=_vmem_limit(budget, block_in, block_out),
            ),
        )(xf)
        return out.reshape(N, 1, H, W)

    # General fallback: H*W > 128 and not a multiple of 128.  Flatten spatial dims and tile
    # the lane axis with a multiple of 128; the ragged tail's OOB reads only feed masked
    # output lanes (benign).
    xf = x.reshape(N, C, hw)
    tsp = (max(128, target // max(1, C * itemsize)) // 128) * 128
    tsp = max(128, min(tsp, (hw // 128) * 128))
    if N * pl.cdiv(hw, tsp) < 8:  # keep enough steps for megacore sharding
        blocks_needed = pl.cdiv(8, max(1, N))
        tsp_small = max(128, (pl.cdiv(hw, blocks_needed) // 128) * 128)
        tsp = min(tsp, tsp_small)
    grid = (N, pl.cdiv(hw, tsp))
    block_in = C * tsp * itemsize
    block_out = tsp * itemsize
    out = pl.pallas_call(
        kernel,
        out_shape=jax.ShapeDtypeStruct((N, 1, hw), x.dtype),
        grid_spec=pl.GridSpec(
            grid=grid,
            in_specs=[pl.BlockSpec((1, C, tsp), lambda n, s: (n, 0, s))],
            out_specs=pl.BlockSpec((1, 1, tsp), lambda n, s: (n, 0, s)),
        ),
        compiler_params=pltpu.CompilerParams(
            dimension_semantics=("parallel", "parallel"),
            vmem_limit_bytes=_vmem_limit(budget, block_in, block_out),
        ),
    )(xf)
    return out.reshape(N, 1, H, W)


if __name__ == "__main__":
    key = jax.random.PRNGKey(0)
    k0, k1, k2, k3 = jax.random.split(key, 4)

    # Primary shape (module usage): W not a multiple of 128 but H*W % 128 == 0
    # -> re-folded lane-dense (rows, 128) path.
    x = jax.random.normal(k0, (2, 4, 16, 16), dtype=jnp.float32)
    out = global_average_pooling(x)
    jax.block_until_ready(out)
    ref = jnp.mean(x, axis=1, keepdims=True)
    assert out.shape == (2, 1, 16, 16), out.shape
    assert out.dtype == x.dtype, out.dtype
    assert jnp.allclose(out, ref, atol=1e-5, rtol=1e-5)

    # Lane-dense 4D path (W multiple of 128).
    x2 = jax.random.normal(k1, (2, 3, 8, 128), dtype=jnp.float32)
    out2 = global_average_pooling(x2)
    jax.block_until_ready(out2)
    assert jnp.allclose(out2, jnp.mean(x2, axis=1, keepdims=True), atol=1e-5, rtol=1e-5)

    # Small-spatial path (H*W <= 128): images batched per block.
    x3 = jax.random.normal(k2, (2, 5, 7, 7), dtype=jnp.float32)
    out3 = global_average_pooling(x3)
    jax.block_until_ready(out3)
    assert jnp.allclose(out3, jnp.mean(x3, axis=1, keepdims=True), atol=1e-5, rtol=1e-5)

    # General fallback (H*W > 128, not a multiple of 128): flat lane tiling with ragged tail.
    x4 = jax.random.normal(k3, (2, 4, 10, 15), dtype=jnp.float32)
    out4 = global_average_pooling(x4)
    jax.block_until_ready(out4)
    assert jnp.allclose(out4, jnp.mean(x4, axis=1, keepdims=True), atol=1e-5, rtol=1e-5)

    print("KERNEL_OK")
</pallas_src>

<mosaic_0001>
module attributes {stable_mosaic.version = 11 : i64} {
  func.func @_gap_kernel(%arg0: i32, %arg1: i32, %arg2: memref<1x4x2x128xf32, #tpu.memory_space<vmem>>, %arg3: memref<1x1x2x128xf32, #tpu.memory_space<vmem>>) attributes {dimension_semantics = [#tpu.dimension_semantics<parallel>, #tpu.dimension_semantics<parallel>], iteration_bounds = array<i64: 2, 1>, scalar_prefetch = 0 : i64, scratch_operands = 0 : i64, tpu.core_type = #tpu.core_type<tc>, window_params = [{transform_indices = @transform_0, window_bounds = array<i64: 1, 4, 2, 128>}, {transform_indices = @transform_1, window_bounds = array<i64: 1, 1, 2, 128>}]} {
    %c0 = arith.constant 0 : index
    %c0_0 = arith.constant 0 : index
    %c0_1 = arith.constant 0 : index
    %c0_2 = arith.constant 0 : index
    %0 = vector.load %arg2[%c0, %c0_0, %c0_1, %c0_2] : memref<1x4x2x128xf32, #tpu.memory_space<vmem>>, vector<1x4x2x128xf32>
    %cst = arith.constant dense<0.000000e+00> : vector<1x2x128xf32>
    %1 = vector.multi_reduction <add>, %0, %cst [1] : vector<1x4x2x128xf32> to vector<1x2x128xf32>
    %2 = vector.shape_cast %1 : vector<1x2x128xf32> to vector<1x1x2x128xf32>
    %cst_3 = arith.constant 2.500000e-01 : f32
    %3 = vector.broadcast %cst_3 : f32 to vector<1x1x2x128xf32>
    %4 = arith.mulf %2, %3 : vector<1x1x2x128xf32>
    %c0_4 = arith.constant 0 : index
    %c0_5 = arith.constant 0 : index
    %c0_6 = arith.constant 0 : index
    %c0_7 = arith.constant 0 : index
    %5 = vector.load %arg3[%c0_4, %c0_5, %c0_6, %c0_7] : memref<1x1x2x128xf32, #tpu.memory_space<vmem>>, vector<1x1x2x128xf32>
    tpu.vector_store %arg3[%c0_4, %c0_5, %c0_6, %c0_7], %4 {strides = array<i32>} : memref<1x1x2x128xf32, #tpu.memory_space<vmem>>, vector<1x1x2x128xf32>,
    return
  }
  func.func @transform_0(%arg0: i32, %arg1: i32) -> (i32, i32, i32, i32) {
    %c0_i32 = arith.constant 0 : i32
    %c0_i32_0 = arith.constant 0 : i32
    %c0_i32_1 = arith.constant 0 : i32
    return %arg0, %c0_i32, %arg1, %c0_i32_0 : i32, i32, i32, i32
  }
  func.func @transform_1(%arg0: i32, %arg1: i32) -> (i32, i32, i32, i32) {
    %c0_i32 = arith.constant 0 : i32
    %c0_i32_0 = arith.constant 0 : i32
    %c0_i32_1 = arith.constant 0 : i32
    return %arg0, %c0_i32, %arg1, %c0_i32_0 : i32, i32, i32, i32
  }
}

</mosaic_0001>

<bundles_post_ra>
// kernel: tpu_custom_call.1
= control target key start
LH: loop header
LB: loop body
LE: loop exit
PB: predicated region body
PF: predicated region fallthrough
CT: control target
= control target key end

     0   :  { %6 = vsyncpa [#allocation3], 0  ;;  %s643_s0 = inlined_call_operand.hbm [shape: f32[2,4,2,128], index: 0, kind: input, shape index: {}]   ;;  %s644_s1 = inlined_call_operand.hbm [shape: f32[2,1,2,128], index: 1, kind: output, shape index: {}]  }
   0x1   :  { %8 = vsyncpa [#allocation3 + $0x1], 0 }
   0x2   :  { %9 = vsyncpa [#allocation4], 0 }
   0x3   :  { %11 = vsyncpa [#allocation4 + $0x1], 0  ;;  %s469_s6 = smov 0   ;;  %s471_s7 = smov 0  }
   0x4   :  { %s473_s8 = smov 0   ;;  %s475_s9 = smov 0  }
   0x5   :  { %s477_s10 = smov 0   ;;  %s479_s11 = smov 0  }
   0x6 LB: > { %s262_s12 = sadd.s32 4294967295, %s453_s11   ;;  %s263_s13 = sadd.s32 4294967294, %s453_s11   ;;  %s453_s11 = sphi %s479_s11, %s17_s11   ;;  %s449_s10 = sphi %s477_s10, %s659_s10   ;;  %s445_s9 = sphi %s475_s9, %s658_s9   ;;  %s441_s8 = sphi %s473_s8, %s657_s8   ;;  %s437_s7 = sphi %s471_s7, %s656_s7   ;;  %s433_s6 = sphi %s469_s6, %s655_s6  }
   0x7   : > { %s29_s14 = sadd.s32 1, %s449_s10  ;;  %s38_s15 = sadd.s32 1, %s441_s8 }
   0x8   : > { %p31_p0 = scmp.ge.s32.totalorder %s29_s14, 2  ;;  %p45_p1 = scmp.ne.s32.totalorder %s441_s8, %s437_s7 }
   0x9   : > { %p46_p2 = scmp.eq.s32.totalorder %s453_s11, 0  ;;  %p51_p3 = scmp.ne.s32.totalorder %s437_s7, %s433_s6 }
   0xa   : > { %s661_s14 = smov (%p31_p0, %s29_s14), 0  ;;  %p52_p5 = scmp.eq.s32.totalorder %s262_s12, 0 }
   0xb   : > { %p510_p4 = por %p46_p2, %p45_p1  ;;  %s33_s17 = ssub.s32 %s449_s10, %s661_s14 }
   0xc   : > { %p77_p6 = scmp.eq.s32.totalorder %s262_s12, 1  ;;  %p36_p7 = scmp.eq.s32.totalorder %s33_s17, 0 }
   0xd   : > { %p516_p8 = por %p52_p5, %p51_p3  ;;  %p83_p10 = scmp.eq.s32.totalorder %s263_s13, 1 }
   0xe   : > { %p520_p9 = por %p77_p6, %p45_p1  ;;  %p289_p13 = scmp.lt.s32.totalorder %s453_s11, 2 }
   0xf   : > { %s525_s20 = scalar_select %p36_p7, %s441_s8, %s38_s15  }
  0x10   : > { %s648_s19 = scalar_select %p520_p9, 1, 0 }
  0x11   : > { %p527_p11 = por %p83_p10, %p51_p3  ;;  %s103_s22 = sand.u32 1, %s441_s8  }
  0x12   : > { %s266_s23 = sshll.u32 %s103_s22, 3  ;;  %s276_s24 = sshll.u32 %s449_s10, 7 }
  0x13   : > { %s649_s21 = scalar_select %p527_p11, 1, 0 }
  0x14   : > { %s538_s27 = scalar_lea.hbm %s643_s0, %s276_s24  ;;  %s107_s28 = scalar_lea.vmem [#allocation2], %s266_s23 }
  0x15   : > { %s115_s29 = sshll.u32 %s107_s28, 4  ;;  %p544_p0 = pnand %p289_p13, %p510_p4  ;;  %s540_s29 = int_to_ptr.vmem [resolvable:$true] %s115_s29 }
  0x16   : > { %s549_s2 = scalar_lea.sflag [#allocation3], %s103_s22  ;;  %s341_s3 = scalar_lea.hbm %s538_s27, 128 }
  0x17   : > { %p342_p2 = scmp.ne.s32.totalorder %s538_s27, %s341_s3  ;;  %p343_p3 = pneg %p544_p0 }
  0x18   : > { %s346_s12 = scalar_lea.hbm %s643_s0, 256  ;;  %p347_p4 = scmp.lt.u32.totalorder %s538_s27, %s643_s0 }
  0x19   : > { %p344_p5 = pnand %p343_p3, %p342_p2  ;;  %p348_p7 = scmp.lt.u32.totalorder %s346_s12, %s341_s3 }
  0x1a   : > { %p350_p13 = scmp.lt.u32.totalorder %s341_s3, %s538_s27 }
  0x1b   : > { %p345_p6 = pneg %p344_p5  ;;  %p349_p10 = por %p348_p7, %p347_p4 }
  0x1d   : > { %p351_p12 = por %p350_p13, %p349_p10 }
  0x1f   : > { %p352_p1 = pnand %p351_p12, %p345_p6 }
  0x21   : > { %355 = shalt.err (!%p352_p1)
}
  0x22   : > { %s356_s16 = scalar_lea.vmem %s540_s29, 128  ;;  %s455_s17 = smov [#allocation2]  }
  0x23   : > { %p357_p2 = scmp.ne.s32.totalorder %s540_s29, %s356_s16  ;;  %s361_s22 = sshll.u32 %s455_s17, 4  ;;  %s362_s22 = int_to_ptr.vmem [resolvable:$false] %s361_s22 }
  0x24   : > { %s363_s23 = scalar_lea.vmem %s362_s22, 256  ;;  %p364_p9 = scmp.lt.s32.totalorder %s540_s29, %s362_s22 }
  0x25   : > { %p359_p5 = pnand %p357_p2, %p343_p3  ;;  %p365_p4 = scmp.lt.s32.totalorder %s363_s23, %s356_s16 }
  0x27   : > { %p360_p11 = pneg %p359_p5  ;;  %p366_p7 = por %p365_p4, %p364_p9 }
  0x29   : > { %p367_p10 = pnand %p366_p7, %p360_p11 }
  0x2b   : > { %370 = shalt.err (!%p367_p10)
}
  0x2c   : > { %s456_s24 = smov 32   ;;  %s457_s25 = smov 2  }
  0x2d   : > { %284 = dma.hbm_to_vmem [thread:$0]  (!%p544_p0), %s538_s27, 128, %s540_s29, %s549_s2, %s456_s24, %s456_s24, %s457_s25  }
  0x2e   : > { %p123_p12 = scmp.lt.s32.totalorder %s453_s11, 3  ;;  %p651_p1 = scmp.ge.s32.totalorder %s453_s11, 1 }
  0x30   : > { %p124_p3 = pnand %p651_p1, %p123_p12 }
  0x31   : > { %s581_s26 = sand.u32 (!%p124_p3), 1, %s437_s7  }
  0x32   : > { %127 = sbr.rel (%p124_p3) target bundleno = 84 (0x54), region = 24  ;;  %s270_s28 = sshll.u32 (!%p124_p3), %s581_s26, 3 }
  0x33   : > { %s130_s3 = scalar_lea.sflag (!%p124_p3), [#allocation3], %s581_s26  ;;  %s133_s4 = scalar_lea.vmem (!%p124_p3), [#allocation2], %s270_s28 }
  0x39   : > { %424 = dma.done.wait (%p516_p8), %s130_s3, 128  }
  0x3a   : > { %426 = vsyncadd (%p516_p8), %s130_s3, 4294967168  ;;  %vm156_vm0 = vcmask 1041408   ;;  %s271_s27 = sshll.u32 %s581_s26, 1  ;;  %v152_v0 = vld [vmem:[%s133_s4] sm:$0x3]  ;;  %s273_s18 = sshll.u32 %s445_s9, 5 }
  0x3b   : > { %v153_v1 = vld [vmem:[%s133_s4 + $0x2] sm:$0x3]  ;;  %v154_v2 = vld [vmem:[%s133_s4 + $0x4] sm:$0x3]  ;;  %v155_v3 = vld [vmem:[%s133_s4 + $0x6] sm:$0x3]  ;;  %s596_s12 = scalar_lea.hbm %s644_s1, %s273_s18 }
  0x3c   : > { %v157_v4 = vsel %vm156_vm0, %v152_v0, 0.0  ;;  %v158_v5 = vsel %vm156_vm0, %v153_v1, 0.0  ;;  %v160_v6 = vsel %vm156_vm0, %v154_v2, 0.0  ;;  %v162_v8 = vsel %vm156_vm0, %v155_v3, 0.0  ;;  %s151_s29 = scalar_lea.vmem [#allocation5], %s271_s27  ;;  %s167_s13 = scalar_lea.sflag [#allocation4], %s581_s26 }
  0x3d   : > { %v159_v7 = vadd.f32 %v158_v5, %v157_v4  ;;  %s181_s30 = sshll.u32 %s151_s29, 4  ;;  %p652_p9 = scmp.ne.s32.totalorder %s648_s19, 0  ;;  %s591_s30 = int_to_ptr.vmem [resolvable:$true] %s181_s30 }
  0x3e   : > { %s371_s15 = scalar_lea.vmem %s591_s30, 32  ;;  %s458_s9 = smov [#allocation5]  }
  0x3f   : > { %v161_v9 = vadd.f32 %v160_v6, %v159_v7  ;;  %p372_p8 = scmp.ne.s32.totalorder %s591_s30, %s371_s15  ;;  %s375_s16 = sshll.u32 %s458_s9, 4  ;;  %s376_s16 = int_to_ptr.vmem [resolvable:$false] %s375_s16 }
  0x40   : > { %s377_s17 = scalar_lea.vmem %s376_s16, 64  ;;  %p378_p6 = scmp.lt.s32.totalorder %s591_s30, %s376_s16 }
  0x41   : > { %v163_v10 = vadd.f32 %v162_v8, %v161_v9  ;;  %p373_p11 = pnand %p372_p8, %p652_p9  ;;  %p379_p13 = scmp.lt.s32.totalorder %s377_s17, %s371_s15 }
  0x43   : > { %v164_v11 = vmul.f32 0.25, %v163_v10  ;;  %p374_p0 = pneg %p373_p11  ;;  %p380_p2 = por %p379_p13, %p378_p6 }
  0x45   : > { %165 = vst [vmem:[%s151_s29] sm:$0x3] %v164_v11  ;;  %p381_p5 = pnand %p380_p2, %p374_p0 }
  0x47   : > { %384 = shalt.err (!%p381_p5)
}
  0x48   : > { %s385_s22 = scalar_lea.hbm %s596_s12, 32  ;;  %s389_s25 = scalar_lea.hbm %s644_s1, 64 }
  0x49   : > { %p386_p4 = scmp.ne.s32.totalorder %s596_s12, %s385_s22  ;;  %p390_p12 = scmp.lt.u32.totalorder %s596_s12, %s644_s1 }
  0x4a   : > { %p391_p1 = scmp.lt.u32.totalorder %s389_s25, %s385_s22  ;;  %p393_p8 = scmp.lt.u32.totalorder %s385_s22, %s596_s12 }
  0x4b   : > { %p387_p7 = pnand %p386_p4, %p652_p9 }
  0x4c   : > { %p392_p3 = por %p391_p1, %p390_p12 }
  0x4d   : > { %p388_p10 = pneg %p387_p7 }
  0x4e   : > { %p394_p11 = por %p393_p8, %p392_p3 }
  0x50   : > { %p395_p0 = pnand %p394_p11, %p388_p10 }
  0x52   : > { %398 = shalt.err (!%p395_p0)
}
  0x53   : > { %279 = dma.vmem_to_hbm [thread:$0]  (%p652_p9), %s591_s30, 32, %s596_s12, %s167_s13  }
  0x54 PF: > { %s193_s3 = sand.u32 1, %s433_s6   ;;  %p653_p6 = scmp.ne.s32.totalorder %s649_s21, 0 }
  0x55   : > { %p654_p13 = scmp.ge.s32.totalorder %s453_s11, 2  ;;  %s194_s4 = scalar_lea.sflag [#allocation4], %s193_s3 }
  0x57   : > { %p286_p2 = pnand %p654_p13, %p653_p6 }
  0x59   : > { %428 = dma.done.wait (!%p286_p2), %s194_s4, 32  }
  0x5a   : > { %430 = vsyncadd (!%p286_p2), %s194_s4, 4294967264  ;;  %s17_s11 = sadd.s32 1, %s453_s11   ;;  %s655_s6 = smov %s437_s7 }
  0x5b   : > { %p14_p5 = scmp.ge.s32.totalorder %s17_s11, 4   ;;  %s656_s7 = smov %s441_s8 }
  0x5c   : > { %s657_s8 = smov %s525_s20  ;;  %s658_s9 = smov %s449_s10 }
  0x5d   : > { %s659_s10 = smov %s661_s14  ;;  %16 = sbr.rel (!%p14_p5) target bundleno = 6 (0x6), region = 69 }
  0x64   :  { %199 = vsyncpa [#allocation3], 1 }
  0x65   :  { %201 = vsyncpa [#allocation3 + $0x1], 1 }
  0x66   :  { %202 = vsyncpa [#allocation4], 1 }
  0x67   :  { %204 = vsyncpa [#allocation4 + $0x1], 1 }

</bundles_post_ra>
